<compile_context>
chip_gen: v7x
topology: tpu7x:2x2x1
jax: 0.10.0
libtpu: 0.0.40
codegen_flags: <defaults>
</compile_context>

<pallas_src>
import jax
import jax.numpy as jnp
from jax.experimental import pallas as pl
from jax.experimental.pallas import tpu as pltpu

LANE = 128       # lane width: hidden / output dims are zero-padded to this
TM_MAX = 1024    # max batch-tile rows for large batches


def _round_up(n, m):
    return ((n + m - 1) // m) * m


def _pick_batch_tile(batch):
    """Adaptive batch tile (rows per grid step).

    batch <= TM_MAX : one grid step, tile = batch rounded to 8-row sublanes
                      (no 128-row padding, no wrapper pad op).
    batch >  TM_MAX : 128-row-multiple tiles up to TM_MAX sized so the grid
                      has >= 2 steps (second v7x TC gets work, per-step
                      overhead amortized).
    """
    if batch <= TM_MAX:
        return _round_up(batch, 8)
    return min(TM_MAX, _round_up(pl.cdiv(batch, 2), LANE))


def mlp_kernel(x_ref, w1_ref, b1_ref, w2_ref, b2_ref, o_ref):
    # In-kernel f32 -> bf16 cast of x (hides under the matmul; avoids a
    # separate XLA cast op + extra HBM round-trip in the wrapper).
    x = x_ref[...].astype(jnp.bfloat16)
    # fc1: x @ W1 on the MXU (bf16 operands, f32 accumulation).
    h = jnp.dot(x, w1_ref[...], preferred_element_type=jnp.float32)
    # Bias + ReLU in f32 on the VPU (v5e has no bf16 VALU; free on v6e/v7x).
    h = jnp.maximum(h + b1_ref[...], 0.0)
    # fc2: downcast activation to bf16 for the second MXU pass.
    y = jnp.dot(h.astype(jnp.bfloat16), w2_ref[...],
                preferred_element_type=jnp.float32)
    o_ref[...] = (y + b2_ref[...]).astype(o_ref.dtype)


def prepare_params(w1, b1, w2, b2):
    """One-time parameter prep (outside the hot path).

    Takes PyTorch nn.Linear layouts:
      w1: (hidden, in), b1: (hidden,), w2: (out, hidden), b2: (out,)
    Returns (in, hidden_p) / (hidden_p, out_p) bf16 weights with hidden/out
    zero-padded to LANE multiples, and (1, *) f32 padded biases.
    """
    hidden, in_size = w1.shape
    out_size, _ = w2.shape
    hp = _round_up(hidden, LANE)
    op = _round_up(out_size, LANE)

    w1p = jnp.zeros((in_size, hp), jnp.bfloat16).at[:, :hidden].set(
        w1.T.astype(jnp.bfloat16))
    b1p = jnp.zeros((1, hp), jnp.float32).at[:, :hidden].set(
        b1.astype(jnp.float32))
    w2p = jnp.zeros((hp, op), jnp.bfloat16).at[:hidden, :out_size].set(
        w2.T.astype(jnp.bfloat16))
    b2p = jnp.zeros((1, op), jnp.float32).at[:, :out_size].set(
        b2.astype(jnp.float32))
    return w1p, b1p, w2p, b2p, out_size


def simple_model_forward(x, w1p, b1p, w2p, b2p, output_size):
    """Forward pass: relu(x @ W1 + b1) @ W2 + b2.

    x: (batch, input_size) f32 (cast to bf16 inside the kernel).
    Returns (batch, output_size) f32.
    """
    batch, in_size = x.shape
    hp = w1p.shape[1]
    op = w2p.shape[1]

    tm = _pick_batch_tile(batch)
    mp = _round_up(batch, tm)
    if mp != batch:
        # Only large, non-tile-aligned batches pay for this pad; padded rows
        # are zeros and sliced off below.
        x = jnp.zeros((mp, in_size), x.dtype).at[:batch].set(x)

    grid = (mp // tm,)
    out = pl.pallas_call(
        mlp_kernel,
        out_shape=jax.ShapeDtypeStruct((mp, op), jnp.float32),
        grid_spec=pltpu.PrefetchScalarGridSpec(
            num_scalar_prefetch=0,
            grid=grid,
            in_specs=[
                pl.BlockSpec((tm, in_size), lambda i: (i, 0)),
                # Constant index_maps -> weights/biases stay VMEM-resident
                # across all batch tiles (never re-DMA'd).
                pl.BlockSpec((in_size, hp), lambda i: (0, 0)),
                pl.BlockSpec((1, hp), lambda i: (0, 0)),
                pl.BlockSpec((hp, op), lambda i: (0, 0)),
                pl.BlockSpec((1, op), lambda i: (0, 0)),
            ],
            out_specs=pl.BlockSpec((tm, op), lambda i: (i, 0)),
        ),
        compiler_params=pltpu.CompilerParams(
            # Shards batch tiles across the 2 TCs on v7x when grid > 1.
            dimension_semantics=("parallel",),
        ),
    )(x, w1p, b1p, w2p, b2p)

    # Slice away batch / lane padding (no-op on batch when tile == batch).
    return out[:batch, :output_size]


if __name__ == "__main__":
    # Small shapes consistent with the module.
    batch, input_size, hidden_size, output_size = 8, 32, 64, 16

    key = jax.random.PRNGKey(0)
    kx, kw1, kb1, kw2, kb2 = jax.random.split(key, 5)

    x = jax.random.normal(kx, (batch, input_size), dtype=jnp.float32)
    # Uniform init roughly matching PyTorch nn.Linear scale.
    bound1 = 1.0 / (input_size ** 0.5)
    bound2 = 1.0 / (hidden_size ** 0.5)
    w1 = jax.random.uniform(kw1, (hidden_size, input_size), jnp.float32, -bound1, bound1)
    b1 = jax.random.uniform(kb1, (hidden_size,), jnp.float32, -bound1, bound1)
    w2 = jax.random.uniform(kw2, (output_size, hidden_size), jnp.float32, -bound2, bound2)
    b2 = jax.random.uniform(kb2, (output_size,), jnp.float32, -bound2, bound2)

    # One-time parameter prep (transpose + pad + bf16 cast) -- outside hot path.
    w1p, b1p, w2p, b2p, out_size = prepare_params(w1, b1, w2, b2)

    out = simple_model_forward(x, w1p, b1p, w2p, b2p, out_size)
    jax.block_until_ready(out)
    assert out.shape == (batch, output_size)

    # 1) Tight check vs a bf16-operand / f32-accumulation reference (same
    #    numerics as the kernel's MXU path).
    ref_h = jnp.maximum(
        jnp.dot(x.astype(jnp.bfloat16), w1.T.astype(jnp.bfloat16),
                preferred_element_type=jnp.float32) + b1, 0.0)
    ref_bf16 = jnp.dot(ref_h.astype(jnp.bfloat16), w2.T.astype(jnp.bfloat16),
                       preferred_element_type=jnp.float32) + b2
    assert jnp.allclose(out, ref_bf16, atol=1e-4, rtol=1e-4)

    # 2) Loose check vs the full-f32 PyTorch-semantics reference (bf16 operand
    #    rounding only -- intentional, documented above).
    ref_f32 = jnp.maximum(x @ w1.T + b1, 0.0) @ w2.T + b2
    assert jnp.allclose(out, ref_f32, atol=1e-1, rtol=1e-1)

    print("KERNEL_OK")
</pallas_src>

<mosaic_0001>
module attributes {stable_mosaic.version = 11 : i64} {
  func.func @mlp_kernel(%arg0: i32, %arg1: memref<8x32xf32, #tpu.memory_space<vmem>>, %arg2: memref<32x128xbf16, #tpu.memory_space<vmem>>, %arg3: memref<1x128xf32, #tpu.memory_space<vmem>>, %arg4: memref<128x128xbf16, #tpu.memory_space<vmem>>, %arg5: memref<1x128xf32, #tpu.memory_space<vmem>>, %arg6: memref<8x128xf32, #tpu.memory_space<vmem>>) attributes {dimension_semantics = [#tpu.dimension_semantics<parallel>], iteration_bounds = array<i64: 1>, scalar_prefetch = 0 : i64, scratch_operands = 0 : i64, tpu.core_type = #tpu.core_type<tc>, window_params = [{transform_indices = @transform_0, window_bounds = array<i64: 8, 32>}, {pipeline_mode = #tpu.pipeline_mode<synchronous>, transform_indices = @transform_1, window_bounds = array<i64: 32, 128>}, {pipeline_mode = #tpu.pipeline_mode<synchronous>, transform_indices = @transform_2, window_bounds = array<i64: 1, 128>}, {pipeline_mode = #tpu.pipeline_mode<synchronous>, transform_indices = @transform_3, window_bounds = array<i64: 128, 128>}, {pipeline_mode = #tpu.pipeline_mode<synchronous>, transform_indices = @transform_4, window_bounds = array<i64: 1, 128>}, {transform_indices = @transform_5, window_bounds = array<i64: 8, 128>}]} {
    %c0 = arith.constant 0 : index
    %c0_0 = arith.constant 0 : index
    %0 = vector.load %arg1[%c0, %c0_0] : memref<8x32xf32, #tpu.memory_space<vmem>>, vector<8x32xf32>
    %1 = arith.truncf %0 : vector<8x32xf32> to vector<8x32xbf16>
    %c0_1 = arith.constant 0 : index
    %c0_2 = arith.constant 0 : index
    %2 = vector.load %arg2[%c0_1, %c0_2] : memref<32x128xbf16, #tpu.memory_space<vmem>>, vector<32x128xbf16>
    %cst = arith.constant dense<0.000000e+00> : vector<8x128xf32>
    %3 = tpu.matmul %1, %2, %cst {dimension_numbers = #tpu.dot_dimension_numbers<[1], [0], [0], [1], [0, 0, 1, 1], [], []>} : vector<8x32xbf16>, vector<32x128xbf16>, vector<8x128xf32> -> vector<8x128xf32>
    %c0_3 = arith.constant 0 : index
    %c0_4 = arith.constant 0 : index
    %4 = vector.load %arg3[%c0_3, %c0_4] : memref<1x128xf32, #tpu.memory_space<vmem>>, vector<1x128xf32>
    %5 = vector.broadcast %4 : vector<1x128xf32> to vector<8x128xf32>
    %6 = arith.addf %3, %5 : vector<8x128xf32>
    %cst_5 = arith.constant 0.000000e+00 : f32
    %7 = vector.broadcast %cst_5 : f32 to vector<8x128xf32>
    %8 = arith.maximumf %6, %7 : vector<8x128xf32>
    %9 = arith.truncf %8 : vector<8x128xf32> to vector<8x128xbf16>
    %c0_6 = arith.constant 0 : index
    %c0_7 = arith.constant 0 : index
    %10 = vector.load %arg4[%c0_6, %c0_7] : memref<128x128xbf16, #tpu.memory_space<vmem>>, vector<128x128xbf16>
    %cst_8 = arith.constant dense<0.000000e+00> : vector<8x128xf32>
    %11 = tpu.matmul %9, %10, %cst_8 {dimension_numbers = #tpu.dot_dimension_numbers<[1], [0], [0], [1], [0, 0, 1, 1], [], []>} : vector<8x128xbf16>, vector<128x128xbf16>, vector<8x128xf32> -> vector<8x128xf32>
    %c0_9 = arith.constant 0 : index
    %c0_10 = arith.constant 0 : index
    %12 = vector.load %arg5[%c0_9, %c0_10] : memref<1x128xf32, #tpu.memory_space<vmem>>, vector<1x128xf32>
    %13 = vector.broadcast %12 : vector<1x128xf32> to vector<8x128xf32>
    %14 = arith.addf %11, %13 : vector<8x128xf32>
    %c0_11 = arith.constant 0 : index
    %c0_12 = arith.constant 0 : index
    %15 = vector.load %arg6[%c0_11, %c0_12] : memref<8x128xf32, #tpu.memory_space<vmem>>, vector<8x128xf32>
    tpu.vector_store %arg6[%c0_11, %c0_12], %14 {strides = array<i32>} : memref<8x128xf32, #tpu.memory_space<vmem>>, vector<8x128xf32>,
    return
  }
  func.func @transform_0(%arg0: i32) -> (i32, i32) {
    %c0_i32 = arith.constant 0 : i32
    %c0_i32_0 = arith.constant 0 : i32
    return %arg0, %c0_i32 : i32, i32
  }
  func.func @transform_1(%arg0: i32) -> (i32, i32) {
    %c0_i32 = arith.constant 0 : i32
    %c0_i32_0 = arith.constant 0 : i32
    %c0_i32_1 = arith.constant 0 : i32
    return %c0_i32, %c0_i32_0 : i32, i32
  }
  func.func @transform_2(%arg0: i32) -> (i32, i32) {
    %c0_i32 = arith.constant 0 : i32
    %c0_i32_0 = arith.constant 0 : i32
    %c0_i32_1 = arith.constant 0 : i32
    return %c0_i32, %c0_i32_0 : i32, i32
  }
  func.func @transform_3(%arg0: i32) -> (i32, i32) {
    %c0_i32 = arith.constant 0 : i32
    %c0_i32_0 = arith.constant 0 : i32
    %c0_i32_1 = arith.constant 0 : i32
    return %c0_i32, %c0_i32_0 : i32, i32
  }
  func.func @transform_4(%arg0: i32) -> (i32, i32) {
    %c0_i32 = arith.constant 0 : i32
    %c0_i32_0 = arith.constant 0 : i32
    %c0_i32_1 = arith.constant 0 : i32
    return %c0_i32, %c0_i32_0 : i32, i32
  }
  func.func @transform_5(%arg0: i32) -> (i32, i32) {
    %c0_i32 = arith.constant 0 : i32
    %c0_i32_0 = arith.constant 0 : i32
    return %arg0, %c0_i32 : i32, i32
  }
}

</mosaic_0001>

<bundles_post_ra>
// kernel: tpu_custom_call.1
= control target key start
LH: loop header
LB: loop body
LE: loop exit
PB: predicated region body
PF: predicated region fallthrough
CT: control target
= control target key end

     0   :  { %10 = vsyncpa [#allocation3], 0  ;;  %s523_s0 = inlined_call_operand.hbm [shape: f32[8,32], index: 0, kind: input, shape index: {}]   ;;  %s524_s1 = inlined_call_operand.hbm [shape: bf16[32,128], index: 1, kind: input, shape index: {}]   ;;  %s525_s2 = inlined_call_operand.vmem [shape: f32[1,128], index: 2, kind: input, shape index: {}]   ;;  %s526_s3 = inlined_call_operand.hbm [shape: bf16[128,128], index: 3, kind: input, shape index: {}]   ;;  %s527_s4 = inlined_call_operand.vmem [shape: f32[1,128], index: 4, kind: input, shape index: {}]   ;;  %s528_s5 = inlined_call_operand.hbm [shape: f32[8,128], index: 5, kind: output, shape index: {}]  }
   0x1   :  { %11 = vsyncpa [#allocation6], 0 }
   0x2   :  { %12 = vsyncpa [#allocation4], 0  ;;  %s425_s18 = smov [#allocation5]   ;;  %s331_s22 = scalar_lea.hbm %s524_s1, 256 }
   0x3   :  { %s28_s19 = sshll.u32 %s425_s18, 4  ;;  %p332_p0 = scmp.ne.s32.totalorder %s524_s1, %s331_s22  ;;  %s29_s19 = int_to_ptr.vmem [resolvable:$true] %s28_s19 }
   0x4   :  { %p335_p1 = scmp.lt.u32.totalorder %s331_s22, %s524_s1 }
   0x6   :  { %p337_p2 = pnand %p335_p1, %p332_p0 }
   0x8   :  { %340 = shalt.err (!%p337_p2)
}
   0x9   :  { %s341_s27 = scalar_lea.vmem %s29_s19, 256  ;;  %p346_p4 = scmp.lt.s32.totalorder %s29_s19, %s29_s19 }
   0xa   :  { %p342_p3 = scmp.ne.s32.totalorder %s29_s19, %s341_s27  ;;  %p347_p5 = scmp.lt.s32.totalorder %s341_s27, %s341_s27 }
   0xc   :  { %p348_p6 = por %p347_p5, %p346_p4 }
   0xe   :  { %p349_p7 = pnand %p348_p6, %p342_p3 }
  0x10   :  { %352 = shalt.err (!%p349_p7)
}
  0x11   :  { %s426_s28 = smov 64   ;;  %s427_s29 = smov 4  }
  0x12   :  { %34 = dma.hbm_to_vmem [thread:$0]  %s524_s1, 256, %s29_s19, [#allocation6], %s426_s28, %s426_s28, %s427_s29  }
  0x13   :  { %s428_s7 = smov [#allocation2]   ;;  %s429_s9 = smov [#allocation7]  }
  0x14   :  { %s19_s8 = sshll.u32 %s428_s7, 4  ;;  %s42_s10 = sshll.u32 %s429_s9, 4  ;;  %s20_s8 = int_to_ptr.vmem [resolvable:$true] %s19_s8  ;;  %s43_s10 = int_to_ptr.vmem [resolvable:$true] %s42_s10 }
  0x15   :  { %s353_s13 = scalar_lea.hbm %s523_s0, 128 }
  0x16   :  { %p354_p8 = scmp.ne.s32.totalorder %s523_s0, %s353_s13  ;;  %p357_p9 = scmp.lt.u32.totalorder %s353_s13, %s523_s0 }
  0x18   :  { %p359_p10 = pnand %p357_p9, %p354_p8 }
  0x1a   :  { %362 = shalt.err (!%p359_p10)
}
  0x1b   :  { %s363_s1 = scalar_lea.vmem %s20_s8, 128  ;;  %p368_p12 = scmp.lt.s32.totalorder %s20_s8, %s20_s8 }
  0x1c   :  { %p364_p11 = scmp.ne.s32.totalorder %s20_s8, %s363_s1  ;;  %p369_p13 = scmp.lt.s32.totalorder %s363_s1, %s363_s1 }
  0x1e   :  { %p370_p0 = por %p369_p13, %p368_p12 }
  0x20   :  { %p371_p1 = pnand %p370_p0, %p364_p11 }
  0x22   :  { %374 = shalt.err (!%p371_p1)
}
  0x23   :  { %22 = dma.hbm_to_vmem [thread:$0]  %s523_s0, 128, %s20_s8, [#allocation3]  }
  0x24   :  { %s375_s22 = scalar_lea.hbm %s526_s3, 1024 }
  0x25   :  { %p376_p2 = scmp.ne.s32.totalorder %s526_s3, %s375_s22  ;;  %p379_p3 = scmp.lt.u32.totalorder %s375_s22, %s526_s3 }
  0x27   :  { %p381_p4 = pnand %p379_p3, %p376_p2 }
  0x29   :  { %384 = shalt.err (!%p381_p4)
}
  0x2a   :  { %s385_s27 = scalar_lea.vmem %s43_s10, 1024  ;;  %p390_p6 = scmp.lt.s32.totalorder %s43_s10, %s43_s10 }
  0x2b   :  { %p386_p5 = scmp.ne.s32.totalorder %s43_s10, %s385_s27  ;;  %p391_p7 = scmp.lt.s32.totalorder %s385_s27, %s385_s27 }
  0x2d   :  { %p392_p8 = por %p391_p7, %p390_p6 }
  0x2f   :  { %p393_p9 = pnand %p392_p8, %p386_p5 }
  0x31   :  { %396 = shalt.err (!%p393_p9)
}
  0x32   :  { %48 = dma.hbm_to_vmem [thread:$0]  %s526_s3, 1024, %s43_s10, [#allocation6], %s426_s28, %s426_s28, %s427_s29  }
  0x33   :  { %419 = dma.done.wait [#allocation3], 128  }
  0x34   :  { %420 = vsyncadd [#allocation3], 4294967168 }
  0x35   :  { %421 = dma.done.wait [#allocation6], 1280  }
  0x36   :  { %422 = vsyncadd [#allocation6], 4294966016  ;;  %v430_v0 = vmov 0.0   ;;  %vm431_vm0 = vmmov 0   ;;  %v321_v1 = vld [vmem:[#allocation5] sm:$0xff]   ;;  %v322_v2 = vld [vmem:[#allocation5 + $0x8] sm:$0xff]  }
  0x37   :  { %285 = vmatprep.subr.bf16.mxu0 %v430_v0  ;;  %289 = vmatprep.mubr.msk.bf16.mxu0 %vm431_vm0, %v430_v0  ;;  %v61_v3 = vld [vmem:[#allocation2] sm:$0xff]  ;;  %v323_v4 = vld [vmem:[#allocation7] sm:$0xff]   ;;  %vm86_vm1 = vcmask 261120   ;;  %v325_v7 = vld [vmem:[#allocation7 + $0x10] sm:$0xff]   ;;  %s432_s7 = smov [#allocation8]  }
  0x38   :  { %293 = vmatprep.subr.bf16.mxu1 %v430_v0  ;;  %309 = vmatprep.mubr.msk.bf16.mxu1 %vm431_vm0, %v430_v0  ;;  %v62_v5 = vpack.c.bf16 %v61_v3, %v61_v3  ;;  %v324_v6 = vld [vmem:[#allocation7 + $0x8] sm:$0xff]   ;;  %v326_v8 = vld [vmem:[#allocation7 + $0x18] sm:$0xff]   ;;  %v327_v9 = vld [vmem:[#allocation7 + $0x20] sm:$0xff]   ;;  %s250_s8 = sshll.u32 %s432_s7, 4  ;;  %s251_s8 = int_to_ptr.vmem [resolvable:$true] %s250_s8 }
  0x39   :  { %286 = vmatpush3.bf16.msra.mxu0 %v321_v1  ;;  %294 = vmatpush3.bf16.msra.mxu1 %v323_v4  ;;  %v328_v10 = vld [vmem:[#allocation7 + $0x28] sm:$0xff]   ;;  %v329_v11 = vld [vmem:[#allocation7 + $0x30] sm:$0xff]   ;;  %v330_v12 = vld [vmem:[#allocation7 + $0x38] sm:$0xff]   ;;  %p402_p11 = scmp.lt.s32.totalorder %s251_s8, %s251_s8 }
  0x3a   :  { %287 = vmatprep.subr.bf16.mxu0 %v430_v0  ;;  %295 = vmatprep.subr.bf16.mxu1 %v430_v0  ;;  %v260_v13 = vld [vmem:[%s525_s2] ss:$0 sm:$0xff]  ;;  %s397_s2 = scalar_lea.vmem %s251_s8, 128 }
  0x3b   :  { %v264_v21 = vld [vmem:[%s527_s4] ss:$0 sm:$0xff]  ;;  %p398_p10 = scmp.ne.s32.totalorder %s251_s8, %s397_s2  ;;  %p403_p12 = scmp.lt.s32.totalorder %s397_s2, %s397_s2 }
  0x3d   :  { %288 = vmatpush3.bf16.msra.mxu0 %v322_v2  ;;  %296 = vmatpush3.bf16.msra.mxu1 %v324_v6  ;;  %p404_p13 = por %p403_p12, %p402_p11 }
  0x3e   :  { %297 = vmatprep.subr.bf16.mxu1 %v430_v0 }
  0x3f   :  { %p405_p0 = pnand %p404_p13, %p398_p10 }
  0x40   :  { %290 = vmatmul.mubr.msk.bf16.vlgmr.msra.gmra.mrb[0].mxu0 %vm86_vm1, %v62_v5 }
  0x41   :  { %298 = vmatpush3.bf16.msra.mxu1 %v325_v7 }
  0x42   :  { %299 = vmatprep.subr.bf16.mxu1 %v430_v0 }
  0x45   :  { %300 = vmatpush3.bf16.msra.mxu1 %v326_v8 }
  0x46   :  { %301 = vmatprep.subr.bf16.mxu1 %v430_v0 }
  0x49   :  { %302 = vmatpush3.bf16.msra.mxu1 %v327_v9 }
  0x4a   :  { %303 = vmatprep.subr.bf16.mxu1 %v430_v0 }
  0x4d   :  { %304 = vmatpush3.bf16.msra.mxu1 %v328_v10 }
  0x4e   :  { %305 = vmatprep.subr.bf16.mxu1 %v430_v0 }
  0x51   :  { %306 = vmatpush3.bf16.msra.mxu1 %v329_v11 }
  0x52   :  { %307 = vmatprep.subr.bf16.mxu1 %v430_v0 }
  0x55   :  { %308 = vmatpush3.bf16.msra.mxu1 %v330_v12 }
 0x113   :  { %v124_v14 = vpop.f32.mrb[0].mxu0 }
 0x114   :  { %v125_v15 = vadd.f32 %v260_v13, %v124_v14  ;;  %v291_v16 = vpop.f32.mrb[1].mxu0 }
 0x115   :  { %v127_v17 = vpop.f32.mrb[2].mxu0 }
 0x116   :  { %v130_v18 = vmax.f32 %v125_v15, 0.0  ;;  %v292_v19 = vpop.f32.mrb[3].mxu0 }
 0x118   :  { %v131_v20 = vpack.c.bf16 %v130_v18, %v130_v18 }
 0x11a   :  { %310 = vmatmul.mubr.bf16.vlgmr.msra.gmra.mrb[0].mxu1 %v131_v20 }
 0x1ed   :  { %v237_v22 = vpop.f32.mrb[0].mxu1 }
 0x1ee   :  { %v238_v23 = vadd.f32 %v264_v21, %v237_v22  ;;  %v311_v24 = vpop.f32.mrb[1].mxu1 }
 0x1ef   :  { %v240_v25 = vpop.f32.mrb[2].mxu1 }
 0x1f0   :  { %243 = vst [vmem:[#allocation8] sm:$0xff] %v238_v23  ;;  %v312_v26 = vpop.f32.mrb[3].mxu1 }
 0x1f1   :  { %408 = shalt.err (!%p405_p0)
}
 0x1f2   :  { %s409_s4 = scalar_lea.hbm %s528_s5, 128 }
 0x1f3   :  { %p410_p1 = scmp.ne.s32.totalorder %s528_s5, %s409_s4  ;;  %p413_p2 = scmp.lt.u32.totalorder %s409_s4, %s528_s5 }
 0x1f5   :  { %p415_p3 = pnand %p413_p2, %p410_p1 }
 0x1f7   :  { %418 = shalt.err (!%p415_p3)
}
 0x1f8   :  { %253 = dma.vmem_to_hbm [thread:$0]  %s251_s8, 128, %s528_s5, [#allocation4]  }
 0x1f9   :  { %423 = dma.done.wait [#allocation4], 128  }
 0x1fa   :  { %424 = vsyncadd [#allocation4], 4294967168 }
 0x1fb   :  { %257 = vsyncpa [#allocation3], 1 }
 0x1fc   :  { %258 = vsyncpa [#allocation6], 1 }
 0x1fd   :  { %259 = vsyncpa [#allocation4], 1 }

</bundles_post_ra>
